<compile_context>
chip_gen: v6e
topology: v6e:2x2x1
jax: 0.10.0
libtpu: 0.0.40
codegen_flags: <defaults>
</compile_context>

<pallas_src>
import jax
import jax.numpy as jnp
from jax import lax
from jax.experimental import pallas as pl
from jax.experimental.pallas import tpu as pltpu

EPS = 1e-6  # FeatureL2Norm epsilon (CNNGeometric definition)


def _round_up(x, m):
    return (x + m - 1) // m * m


def _corr_kernel(a_ref, b_ref, o_ref):
    # a_ref: (1, C, HWp)  -- feature_A, hw_A on lanes (constant across column tiles)
    # b_ref: (1, C, TN)   -- feature_B column tile, hw_B on lanes
    # o_ref: (1, HWp, TN) -- output tile: rows = iA (full norm axis), cols = jB tile
    a = a_ref[0]    # (C, HWp), native dtype
    bt = b_ref[0]   # (C, TN),  native dtype
    # out[iA, jB] = sum_c A[c, iA] * B[c, jB]   (transposed-LHS matmul, f32 accumulate)
    m = lax.dot_general(
        a, bt,
        dimension_numbers=(((0,), (0,)), ((), ())),
        preferred_element_type=jnp.float32,
    )
    # ReLU
    m = jnp.maximum(m, 0.0)
    # FeatureL2Norm over the iA axis (== channel dim of the final NCHW output).
    # Full iA extent is resident in this tile, so the norm is exact. Padded iA rows
    # are zero and do not perturb the sum of squares.
    inv = lax.rsqrt(jnp.sum(m * m, axis=0, keepdims=True) + EPS)  # (1, TN)
    o_ref[0] = (m * inv).astype(o_ref.dtype)


def feature_correlation(feature_A, feature_B, *, tn=256):
    """FeatureCorrelation(shape='3D', normalization=True). NCHW in, (b, h*w, h, w) out."""
    b, c, h, w = feature_A.shape
    hw = h * w
    hw_pad = _round_up(hw, 128)  # lane-dense tiles and unmasked stores

    # A flattened in (w, h) order (matches .transpose(2,3).view): iA = wA*h + hA
    a_t = jnp.transpose(feature_A, (0, 1, 3, 2)).reshape(b, c, hw)
    # B flattened in (h, w) order: jB = hB*w + wB  (pure reshape, no transpose)
    b_t = feature_B.reshape(b, c, hw)
    if hw_pad != hw:
        pad = ((0, 0), (0, 0), (0, hw_pad - hw))
        a_t = jnp.pad(a_t, pad)
        b_t = jnp.pad(b_t, pad)

    # Column-tile size: multiple of 128, divides hw_pad, bounded so VMEM stays small
    # (per-step VMEM ~ c*hw_pad + 2*(hw_pad*tn + c*tn) words).
    tn = max(128, min(tn, hw_pad))
    while hw_pad % tn != 0:  # hw_pad is a multiple of 128, so this stops by tn=128
        tn //= 2
    n_col = hw_pad // tn

    corr = pl.pallas_call(
        _corr_kernel,
        out_shape=jax.ShapeDtypeStruct((b, hw_pad, hw_pad), feature_A.dtype),
        grid_spec=pltpu.PrefetchScalarGridSpec(
            num_scalar_prefetch=0,
            grid=(b, n_col),
            in_specs=[
                # A block: resident per batch element (same block index across j -> no re-DMA)
                pl.BlockSpec((1, c, hw_pad), lambda i, j: (i, 0, 0)),
                # B block: one column tile per grid step
                pl.BlockSpec((1, c, tn), lambda i, j: (i, 0, j)),
            ],
            out_specs=pl.BlockSpec((1, hw_pad, tn), lambda i, j: (i, 0, j)),
        ),
        compiler_params=pltpu.CompilerParams(
            # Both grid axes are independent; lets v7x's two TensorCores split the work.
            dimension_semantics=("parallel", "parallel"),
        ),
    )(a_t, b_t)

    # Final glue: pure slice + reshape (no permute of the big (b, hw, hw) tensor).
    out = corr[:, :hw, :hw].reshape(b, hw, h, w)
    return out


def _reference(feature_A, feature_B):
    # Direct transcription of the PyTorch module (shape='3D', normalization=True).
    b, c, h, w = feature_A.shape
    hw = h * w
    a_t = jnp.transpose(feature_A, (0, 1, 3, 2)).reshape(b, c, hw)
    b_t = jnp.transpose(feature_B.reshape(b, c, hw), (0, 2, 1))
    m = jnp.einsum("bic,bcj->bij", b_t, a_t)
    corr = jnp.transpose(m.reshape(b, h, w, hw), (0, 3, 1, 2))
    corr = jnp.maximum(corr, 0.0)
    norm = jnp.sqrt(jnp.sum(corr * corr, axis=1, keepdims=True) + EPS)
    return corr / norm


if __name__ == "__main__":
    key = jax.random.PRNGKey(0)
    k1, k2 = jax.random.split(key)
    b, c, h, w = 2, 4, 16, 16
    feature_A = jax.random.normal(k1, (b, c, h, w), dtype=jnp.float32)
    feature_B = jax.random.normal(k2, (b, c, h, w), dtype=jnp.float32)

    out = feature_correlation(feature_A, feature_B)
    out = jax.block_until_ready(out)

    ref = jax.block_until_ready(_reference(feature_A, feature_B))
    assert out.shape == (b, h * w, h, w), out.shape
    max_err = float(jnp.max(jnp.abs(out - ref)))
    assert max_err < 1e-3, f"max abs error too large: {max_err}"

    print("KERNEL_OK")
</pallas_src>

<mosaic_0001>
module attributes {stable_mosaic.version = 11 : i64} {
  func.func @_corr_kernel(%arg0: i32, %arg1: i32, %arg2: memref<1x4x256xf32, #tpu.memory_space<vmem>>, %arg3: memref<1x4x256xf32, #tpu.memory_space<vmem>>, %arg4: memref<1x256x256xf32, #tpu.memory_space<vmem>>) attributes {dimension_semantics = [#tpu.dimension_semantics<parallel>, #tpu.dimension_semantics<parallel>], iteration_bounds = array<i64: 2, 1>, scalar_prefetch = 0 : i64, scratch_operands = 0 : i64, tpu.core_type = #tpu.core_type<tc>, window_params = [{transform_indices = @transform_0, window_bounds = array<i64: 1, 4, 256>}, {transform_indices = @transform_1, window_bounds = array<i64: 1, 4, 256>}, {transform_indices = @transform_2, window_bounds = array<i64: 1, 256, 256>}]} {
    %c0 = arith.constant 0 : index
    %c0_0 = arith.constant 0 : index
    %c0_1 = arith.constant 0 : index
    %0 = vector.load %arg2[%c0, %c0_0, %c0_1] : memref<1x4x256xf32, #tpu.memory_space<vmem>>, vector<1x4x256xf32>
    %1 = vector.shape_cast %0 : vector<1x4x256xf32> to vector<4x256xf32>
    %c0_2 = arith.constant 0 : index
    %c0_3 = arith.constant 0 : index
    %c0_4 = arith.constant 0 : index
    %2 = vector.load %arg3[%c0_2, %c0_3, %c0_4] : memref<1x4x256xf32, #tpu.memory_space<vmem>>, vector<1x4x256xf32>
    %3 = vector.shape_cast %2 : vector<1x4x256xf32> to vector<4x256xf32>
    %cst = arith.constant dense<0.000000e+00> : vector<256x256xf32>
    %4 = tpu.matmul %1, %3, %cst {dimension_numbers = #tpu.dot_dimension_numbers<[0], [0], [1], [1], [0, 1, 1, 1], [], []>} : vector<4x256xf32>, vector<4x256xf32>, vector<256x256xf32> -> vector<256x256xf32>
    %cst_5 = arith.constant 0.000000e+00 : f32
    %5 = vector.broadcast %cst_5 : f32 to vector<256x256xf32>
    %6 = arith.maximumf %4, %5 : vector<256x256xf32>
    %7 = arith.mulf %6, %6 : vector<256x256xf32>
    %cst_6 = arith.constant dense<0.000000e+00> : vector<256xf32>
    %8 = vector.multi_reduction <add>, %7, %cst_6 [0] : vector<256x256xf32> to vector<256xf32>
    %9 = vector.shape_cast %8 : vector<256xf32> to vector<1x256xf32>
    %cst_7 = arith.constant 9.99999997E-7 : f32
    %10 = vector.broadcast %cst_7 : f32 to vector<1x256xf32>
    %11 = arith.addf %9, %10 : vector<1x256xf32>
    %12 = math.rsqrt %11 : vector<1x256xf32>
    %13 = vector.broadcast %12 : vector<1x256xf32> to vector<256x256xf32>
    %14 = arith.mulf %6, %13 : vector<256x256xf32>
    %c0_8 = arith.constant 0 : index
    %c0_9 = arith.constant 0 : index
    %c0_10 = arith.constant 0 : index
    %15 = vector.load %arg4[%c0_8, %c0_9, %c0_10] : memref<1x256x256xf32, #tpu.memory_space<vmem>>, vector<1x256x256xf32>
    %16 = vector.shape_cast %15 : vector<1x256x256xf32> to vector<256x256xf32>
    %17 = vector.shape_cast %14 : vector<256x256xf32> to vector<1x256x256xf32>
    tpu.vector_store %arg4[%c0_8, %c0_9, %c0_10], %17 {strides = array<i32>} : memref<1x256x256xf32, #tpu.memory_space<vmem>>, vector<1x256x256xf32>,
    return
  }
  func.func @transform_0(%arg0: i32, %arg1: i32) -> (i32, i32, i32) {
    %c0_i32 = arith.constant 0 : i32
    %c0_i32_0 = arith.constant 0 : i32
    %c0_i32_1 = arith.constant 0 : i32
    return %arg0, %c0_i32, %c0_i32_0 : i32, i32, i32
  }
  func.func @transform_1(%arg0: i32, %arg1: i32) -> (i32, i32, i32) {
    %c0_i32 = arith.constant 0 : i32
    %c0_i32_0 = arith.constant 0 : i32
    return %arg0, %c0_i32, %arg1 : i32, i32, i32
  }
  func.func @transform_2(%arg0: i32, %arg1: i32) -> (i32, i32, i32) {
    %c0_i32 = arith.constant 0 : i32
    %c0_i32_0 = arith.constant 0 : i32
    return %arg0, %c0_i32, %arg1 : i32, i32, i32
  }
}

</mosaic_0001>

<bundles_post_ra>
// kernel: tpu_custom_call.1
= control target key start
LH: loop header
LB: loop body
LE: loop exit
PB: predicated region body
PF: predicated region fallthrough
CT: control target
= control target key end

     0   :  { %7 = vsyncpa [#allocation3], 0  ;;  %s2112_s0 = inlined_call_operand.hbm [shape: f32[2,4,256], index: 0, kind: input, shape index: {}]   ;;  %s2113_s1 = inlined_call_operand.hbm [shape: f32[2,4,256], index: 1, kind: input, shape index: {}]   ;;  %s2114_s2 = inlined_call_operand.hbm [shape: f32[2,256,256], index: 2, kind: output, shape index: {}]  }
   0x1   :  { %9 = vsyncpa [#allocation3 + $0x1], 0 }
   0x2   :  { %10 = vsyncpa [#allocation6], 0 }
   0x3   :  { %12 = vsyncpa [#allocation6 + $0x1], 0 }
   0x4   :  { %13 = vsyncpa [#allocation4], 0 }
   0x5   :  { %15 = vsyncpa [#allocation4 + $0x1], 0  ;;  %s1405_s9 = smov 0   ;;  %s1407_s10 = smov 0  }
   0x6   :  { %s1409_s11 = smov 0   ;;  %s1411_s12 = smov 0  }
   0x7   :  { %s1413_s13 = smov 0   ;;  %s1415_s14 = smov 0  }
   0x8 LB: > { %s1108_s15 = sadd.s32 4294967295, %s1382_s14   ;;  %s1109_s16 = sadd.s32 4294967294, %s1382_s14   ;;  %s1382_s14 = sphi %s1415_s14, %s21_s14   ;;  %s1378_s13 = sphi %s1413_s13, %s2189_s13   ;;  %s1374_s12 = sphi %s1411_s12, %s2188_s12   ;;  %s1370_s11 = sphi %s1409_s11, %s2187_s11   ;;  %s1366_s10 = sphi %s1407_s10, %s2186_s10   ;;  %s1362_s9 = sphi %s1405_s9, %s2185_s9  }
   0x9   : > { %s33_s17 = sadd.s32 1, %s1378_s13  ;;  %s40_s18 = sadd.s32 1, %s1370_s11 }
   0xa   : > { %p35_p0 = scmp.ge.s32.totalorder %s33_s17, 2  ;;  %p47_p1 = scmp.ne.s32.totalorder %s1370_s11, %s1366_s10 }
   0xb   : > { %p48_p2 = scmp.eq.s32.totalorder %s1382_s14, 0  ;;  %p53_p3 = scmp.ne.s32.totalorder %s1366_s10, %s1362_s9 }
   0xc   : > { %s2191_s17 = smov (%p35_p0, %s33_s17), 0  ;;  %p54_p5 = scmp.eq.s32.totalorder %s1108_s15, 0 }
   0xd   : > { %p1446_p4 = por %p48_p2, %p47_p1  ;;  %s37_s20 = ssub.s32 %s1378_s13, %s2191_s17 }
   0xe   : > { %p107_p6 = scmp.eq.s32.totalorder %s1108_s15, 1  ;;  %p38_p7 = scmp.eq.s32.totalorder %s37_s20, 0 }
   0xf   : > { %p1452_p8 = por %p54_p5, %p53_p3  ;;  %p113_p10 = scmp.eq.s32.totalorder %s1109_s16, 1 }
  0x10   : > { %p1456_p9 = por %p107_p6, %p47_p1  ;;  %p1183_p13 = scmp.lt.s32.totalorder %s1382_s14, 2 }
  0x11   : > { %s1461_s23 = scalar_select %p38_p7, %s1370_s11, %s40_s18  }
  0x12   : > { %p1463_p11 = por %p113_p10, %p53_p3  ;;  %s1470_s25 = sand.u32 1, %s1370_s11  }
  0x13   : > { %s1112_s26 = sshll.u32 %s1470_s25, 3  ;;  %s1161_s27 = sshll.u32 %s1378_s13, 7 }
  0x14   : > { %s143_s30 = scalar_lea.hbm %s2112_s0, %s1161_s27  ;;  %s137_s3 = scalar_lea.vmem [#allocation2], %s1112_s26 }
  0x15   : > { %s145_s4 = sshll.u32 %s137_s3, 4  ;;  %p1479_p0 = pnand %p1183_p13, %p1446_p4  ;;  %s146_s4 = int_to_ptr.vmem [resolvable:$true] %s145_s4 }
  0x16   : > { %p1118_p1 = scmp.ge.s32.totalorder %s1382_s14, 1  ;;  %p171_p2 = scmp.lt.s32.totalorder %s1382_s14, 3 }
  0x17   : > { %s134_s6 = scalar_lea.sflag [#allocation3], %s1470_s25  ;;  %p1244_p3 = pneg %p1479_p0 }
  0x18   : > { %s1255_s7 = scalar_lea.vmem %s146_s4, 128  ;;  %s1384_s8 = smov [#allocation2]  }
  0x19   : > { %p1256_p5 = scmp.ne.s32.totalorder %s146_s4, %s1255_s7  ;;  %s1260_s15 = sshll.u32 %s1384_s8, 4  ;;  %s1261_s15 = int_to_ptr.vmem [resolvable:$false] %s1260_s15 }
  0x1a   : > { %s1262_s16 = scalar_lea.vmem %s1261_s15, 256  ;;  %p1263_p4 = scmp.lt.s32.totalorder %s146_s4, %s1261_s15 }
  0x1b   : > { %p1258_p6 = pnand %p1256_p5, %p1244_p3  ;;  %p1264_p10 = scmp.lt.s32.totalorder %s1262_s16, %s1255_s7 }
  0x1d   : > { %p1259_p7 = pneg %p1258_p6  ;;  %p1265_p13 = por %p1264_p10, %p1263_p4 }
  0x1f   : > { %p1266_p12 = pnand %p1265_p13, %p1259_p7 }
  0x21   : > { %1269 = shalt.err (!%p1266_p12)
}
  0x22   : > { %1175 = dma.hbm_to_vmem [thread:$0]  (!%p1479_p0), %s143_s30, 128, %s146_s4, %s134_s6  }
  0x23   : > { %p1497_p5 = pnand %p1118_p1, %p171_p2  ;;  %s164_s28 = scalar_lea.hbm %s2113_s1, %s1161_s27 }
  0x24   : > { %s156_s29 = scalar_lea.vmem [#allocation5], %s1112_s26  ;;  %s153_s7 = scalar_lea.sflag [#allocation6], %s1470_s25 }
  0x25   : > { %s166_s3 = sshll.u32 %s156_s29, 4  ;;  %s1385_s30 = smov [#allocation5]   ;;  %s167_s3 = int_to_ptr.vmem [resolvable:$true] %s166_s3 }
  0x26   : > { %s1283_s8 = scalar_lea.vmem %s167_s3, 128  ;;  %s1288_s4 = sshll.u32 %s1385_s30, 4  ;;  %s1289_s4 = int_to_ptr.vmem [resolvable:$false] %s1288_s4 }
  0x27   : > { %p1284_p12 = scmp.ne.s32.totalorder %s167_s3, %s1283_s8  ;;  %s1290_s6 = scalar_lea.vmem %s1289_s4, 256 }
  0x28   : > { %p1291_p1 = scmp.lt.s32.totalorder %s167_s3, %s1289_s4  ;;  %p1292_p2 = scmp.lt.s32.totalorder %s1290_s6, %s1283_s8 }
  0x29   : > { %p1286_p6 = pnand %p1284_p12, %p1244_p3 }
  0x2a   : > { %p1293_p4 = por %p1292_p2, %p1291_p1 }
  0x2b   : > { %p1287_p7 = pneg %p1286_p6 }
  0x2d   : > { %p1294_p10 = pnand %p1293_p4, %p1287_p7 }
  0x2f   : > { %1297 = shalt.err (!%p1294_p10)
}
  0x30   : > { %1178 = dma.hbm_to_vmem [thread:$0]  (!%p1479_p0), %s164_s28, 128, %s167_s3, %s153_s7  }
  0x31   : > { %175 = sbr.rel (%p1497_p5) target bundleno = 586 (0x24a), region = 28 }
  0x36   : > { %s1513_s25 = sand.u32 1, %s1366_s10  }
  0x37   : > { %s1119_s26 = sshll.u32 %s1513_s25, 3  ;;  %s178_s27 = scalar_lea.sflag [#allocation3], %s1513_s25 }
  0x38   : > { %s181_s15 = scalar_lea.vmem [#allocation2], %s1119_s26 }
  0x39   : > { %1349 = dma.done.wait (%p1452_p8), %s178_s27, 128  }
  0x3a   : > { %1351 = vsyncadd (%p1452_p8), %s178_s27, 4294967168  ;;  %s187_s5 = scalar_lea.sflag [#allocation6], %s1513_s25  ;;  %s190_s16 = scalar_lea.vmem [#allocation5], %s1119_s26 }
  0x3b   : > { %1353 = dma.done.wait (%p1452_p8), %s187_s5, 128  }
  0x3c   : > { %1355 = vsyncadd (%p1452_p8), %s187_s5, 4294967168  ;;  %v1386_v0 = vmov 0.0   ;;  %v218_v1 = vld [vmem:[%s181_s15] sm:$0xff]  ;;  %v219_v2 = vld [vmem:[%s190_s16] sm:$0xff]  ;;  %vm386_vm0 = vcmask 1043456   ;;  %vm289_vm1 = vcmask 31744  }
  0x3d   : > { %455 = vmatprep.mubr.f32.mxu0 %v1386_v0  ;;  %551 = vmatprep.mubr.f32.mxu1 %v1386_v0  ;;  %v288_v3 = vcombine.high %v219_v2, %v219_v2  ;;  %v221_v4 = vcombine.high %v218_v1, %v218_v1  ;;  %s1121_s21 = sshll.u32 %s1513_s25, 9  ;;  %s1163_s19 = sshll.u32 %s1374_s12, 13 }
  0x3e   : > { %223 = vxpose.xlu0.b32.start.end [1/1] (short) %v218_v1, 128  ;;  %s1901_s18 = scalar_lea.vmem [#allocation7], %s1121_s21  ;;  %s2042_s29 = scalar_lea.hbm %s2114_s2, %s1163_s19 }
  0x3f   : > { %1122 = vmatprep.subr.msk.mxu0 %vm386_vm0, %v288_v3  ;;  %1164 = vmatprep.subr.msk.mxu1 %vm386_vm0, %v288_v3  ;;  %s998_s20 = sshll.u32 %s1901_s18, 4  ;;  %s983_s3 = scalar_lea.sflag [#allocation4], %s1513_s25  ;;  %s2044_s20 = int_to_ptr.vmem [resolvable:$true] %s998_s20 }
  0x40   : > { %1123 = vmatpush1.msk.msra.mxu0 %vm386_vm0, %v219_v2  ;;  %1165 = vmatpush1.msk.msra.mxu1 %vm386_vm0, %v219_v2  ;;  %s1298_s7 = scalar_lea.vmem %s2044_s20, 8192  ;;  %s1387_s8 = smov [#allocation7]  }
  0x41   : > { %p1299_p8 = scmp.ne.s32.totalorder %s2044_s20, %s1298_s7  ;;  %s1302_s30 = sshll.u32 %s1387_s8, 4  ;;  %s1303_s30 = int_to_ptr.vmem [resolvable:$false] %s1302_s30 }
  0x42   : > { %s1304_s4 = scalar_lea.vmem %s1303_s30, 16384  ;;  %p1305_p13 = scmp.lt.s32.totalorder %s2044_s20, %s1303_s30 }
  0x43   : > { %p1300_p0 = pnand %p1299_p8, %p1456_p9  ;;  %p1306_p5 = scmp.lt.s32.totalorder %s1304_s4, %s1298_s7 }
  0x45   : > { %p1301_p3 = pneg %p1300_p0  ;;  %p1307_p12 = por %p1306_p5, %p1305_p13 }
  0x47   : > { %p1308_p6 = pnand %p1307_p12, %p1301_p3 }
  0x7b   : > { %255 = vxpose.xlu0.b32.start.end [1/1] (short) %v221_v4, 128 }
  0xba   : > { %v239_v5 = vpop.trf.xlu0 }
  0xbb   : > { %1124 = vmatmul.mubr.msk.f32.vlgmr.msra.gmra.mxu0 %vm289_vm1, %v239_v5 }
  0xbc   : > { %461 = vmatprep.mubr.f32.mxu0 %v1386_v0 }
  0xbe   : > { %v240_v6 = vpop.trf.xlu0 }
  0xbf   : > { %1125 = vmatmul.mubr.msk.f32.gmra.mxu0 %vm289_vm1, %v240_v6 }
  0xc0   : > { %467 = vmatprep.mubr.f32.mxu0 %v1386_v0 }
  0xc2   : > { %v241_v7 = vpop.trf.xlu0 }
  0xc3   : > { %1126 = vmatmul.mubr.msk.f32.gmra.mxu0 %vm289_vm1, %v241_v7 }
  0xc4   : > { %473 = vmatprep.mubr.f32.mxu0 %v1386_v0 }
  0xc6   : > { %v242_v8 = vpop.trf.xlu0 }
  0xc7   : > { %1127 = vmatmul.mubr.msk.f32.gmra.mxu0 %vm289_vm1, %v242_v8 }
  0xc8   : > { %479 = vmatprep.mubr.f32.mxu0 %v1386_v0 }
  0xca   : > { %v243_v9 = vpop.trf.xlu0 }
  0xcb   : > { %1128 = vmatmul.mubr.msk.f32.gmra.mxu0 %vm289_vm1, %v243_v9 }
  0xcc   : > { %485 = vmatprep.mubr.f32.mxu0 %v1386_v0 }
  0xce   : > { %v244_v10 = vpop.trf.xlu0 }
  0xcf   : > { %1129 = vmatmul.mubr.msk.f32.gmra.mxu0 %vm289_vm1, %v244_v10 }
  0xd0   : > { %491 = vmatprep.mubr.f32.mxu0 %v1386_v0 }
  0xd2   : > { %v245_v11 = vpop.trf.xlu0 }
  0xd3   : > { %1130 = vmatmul.mubr.msk.f32.gmra.mxu0 %vm289_vm1, %v245_v11 }
  0xd4   : > { %497 = vmatprep.mubr.f32.mxu0 %v1386_v0 }
  0xd6   : > { %v246_v12 = vpop.trf.xlu0 }
  0xd7   : > { %1131 = vmatmul.mubr.msk.f32.gmra.mxu0 %vm289_vm1, %v246_v12 }
  0xd8   : > { %503 = vmatprep.mubr.f32.mxu0 %v1386_v0 }
  0xda   : > { %v247_v13 = vpop.trf.xlu0 }
  0xdb   : > { %1132 = vmatmul.mubr.msk.f32.gmra.mxu0 %vm289_vm1, %v247_v13 }
  0xdc   : > { %509 = vmatprep.mubr.f32.mxu0 %v1386_v0 }
  0xde   : > { %v248_v14 = vpop.trf.xlu0 }
  0xdf   : > { %1133 = vmatmul.mubr.msk.f32.gmra.mxu0 %vm289_vm1, %v248_v14 }
  0xe0   : > { %515 = vmatprep.mubr.f32.mxu0 %v1386_v0 }
  0xe2   : > { %v249_v15 = vpop.trf.xlu0 }
  0xe3   : > { %1134 = vmatmul.mubr.msk.f32.gmra.mxu0 %vm289_vm1, %v249_v15 }
  0xe4   : > { %521 = vmatprep.mubr.f32.mxu0 %v1386_v0 }
  0xe6   : > { %v250_v16 = vpop.trf.xlu0 }
  0xe7   : > { %1135 = vmatmul.mubr.msk.f32.gmra.mxu0 %vm289_vm1, %v250_v16 }
  0xe8   : > { %527 = vmatprep.mubr.f32.mxu0 %v1386_v0 }
  0xea   : > { %v251_v17 = vpop.trf.xlu0 }
  0xeb   : > { %1136 = vmatmul.mubr.msk.f32.gmra.mxu0 %vm289_vm1, %v251_v17 }
  0xec   : > { %533 = vmatprep.mubr.f32.mxu0 %v1386_v0 }
  0xee   : > { %v252_v18 = vpop.trf.xlu0 }
  0xef   : > { %1137 = vmatmul.mubr.msk.f32.gmra.mxu0 %vm289_vm1, %v252_v18 }
  0xf0   : > { %539 = vmatprep.mubr.f32.mxu0 %v1386_v0 }
  0xf2   : > { %v253_v19 = vpop.trf.xlu0 }
  0xf3   : > { %1138 = vmatmul.mubr.msk.f32.gmra.mxu0 %vm289_vm1, %v253_v19 }
  0xf4   : > { %545 = vmatprep.mubr.f32.mxu0 %v1386_v0 }
  0xf6   : > { %v254_v20 = vpop.trf.xlu0 }
  0xf7   : > { %1139 = vmatmul.mubr.msk.f32.gmra.mxu0 %vm289_vm1, %v254_v20 }
  0xfa   : > { %v271_v21 = vpop.trf.xlu0 }
  0xfb   : > { %1140 = vmatmul.mubr.msk.f32.vlgmr.msra.gmra.mxu1 %vm289_vm1, %v271_v21 }
  0xfc   : > { %557 = vmatprep.mubr.f32.mxu1 %v1386_v0 }
  0xfe   : > { %v272_v22 = vpop.trf.xlu0 }
  0xff   : > { %1141 = vmatmul.mubr.msk.f32.gmra.mxu1 %vm289_vm1, %v272_v22 }
 0x100   : > { %563 = vmatprep.mubr.f32.mxu1 %v1386_v0 }
 0x102   : > { %v273_v23 = vpop.trf.xlu0 }
 0x103   : > { %1142 = vmatmul.mubr.msk.f32.gmra.mxu1 %vm289_vm1, %v273_v23 }
 0x104   : > { %569 = vmatprep.mubr.f32.mxu1 %v1386_v0 }
 0x106   : > { %v274_v24 = vpop.trf.xlu0 }
 0x107   : > { %1143 = vmatmul.mubr.msk.f32.gmra.mxu1 %vm289_vm1, %v274_v24 }
 0x108   : > { %575 = vmatprep.mubr.f32.mxu1 %v1386_v0 }
 0x10a   : > { %v275_v25 = vpop.trf.xlu0 }
 0x10b   : > { %1144 = vmatmul.mubr.msk.f32.gmra.mxu1 %vm289_vm1, %v275_v25 }
 0x10c   : > { %581 = vmatprep.mubr.f32.mxu1 %v1386_v0 }
 0x10e   : > { %v276_v26 = vpop.trf.xlu0 }
 0x10f   : > { %1145 = vmatmul.mubr.msk.f32.gmra.mxu1 %vm289_vm1, %v276_v26 }
 0x110   : > { %587 = vmatprep.mubr.f32.mxu1 %v1386_v0 }
 0x112   : > { %v277_v27 = vpop.trf.xlu0 }
 0x113   : > { %1146 = vmatmul.mubr.msk.f32.gmra.mxu1 %vm289_vm1, %v277_v27 }
 0x114   : > { %593 = vmatprep.mubr.f32.mxu1 %v1386_v0 }
 0x116   : > { %v278_v28 = vpop.trf.xlu0 }
 0x117   : > { %1147 = vmatmul.mubr.msk.f32.gmra.mxu1 %vm289_vm1, %v278_v28 }
 0x118   : > { %599 = vmatprep.mubr.f32.mxu1 %v1386_v0 }
 0x11a   : > { %v279_v29 = vpop.trf.xlu0 }
 0x11b   : > { %1148 = vmatmul.mubr.msk.f32.gmra.mxu1 %vm289_vm1, %v279_v29 }
 0x11c   : > { %605 = vmatprep.mubr.f32.mxu1 %v1386_v0 }
 0x11e   : > { %v280_v30 = vpop.trf.xlu0 }
 0x11f   : > { %1149 = vmatmul.mubr.msk.f32.gmra.mxu1 %vm289_vm1, %v280_v30 }
 0x120   : > { %611 = vmatprep.mubr.f32.mxu1 %v1386_v0 }
 0x122   : > { %v281_v31 = vpop.trf.xlu0 }
 0x123   : > { %1150 = vmatmul.mubr.msk.f32.gmra.mxu1 %vm289_vm1, %v281_v31 }
 0x124   : > { %617 = vmatprep.mubr.f32.mxu1 %v1386_v0 }
 0x126   : > { %v282_v32 = vpop.trf.xlu0 }
 0x127   : > { %1151 = vmatmul.mubr.msk.f32.gmra.mxu1 %vm289_vm1, %v282_v32 }
 0x128   : > { %623 = vmatprep.mubr.f32.mxu1 %v1386_v0 }
 0x12a   : > { %v283_v33 = vpop.trf.xlu0 }
 0x12b   : > { %1152 = vmatmul.mubr.msk.f32.gmra.mxu1 %vm289_vm1, %v283_v33 }
 0x12c   : > { %629 = vmatprep.mubr.f32.mxu1 %v1386_v0 }
 0x12e   : > { %v284_v34 = vpop.trf.xlu0 }
 0x12f   : > { %1153 = vmatmul.mubr.msk.f32.gmra.mxu1 %vm289_vm1, %v284_v34 }
 0x130   : > { %635 = vmatprep.mubr.f32.mxu1 %v1386_v0 }
 0x132   : > { %v285_v35 = vpop.trf.xlu0 }
 0x133   : > { %1154 = vmatmul.mubr.msk.f32.gmra.mxu1 %vm289_vm1, %v285_v35 }
 0x134   : > { %641 = vmatprep.mubr.f32.mxu1 %v1386_v0 }
 0x136   : > { %v286_v36 = vpop.trf.xlu0 }
 0x137   : > { %1155 = vmatmul.mubr.msk.f32.gmra.mxu1 %vm289_vm1, %v286_v36 }
 0x17b   : > { %v457_v37 = vpop.f32.mrf.mxu0 }
 0x17c   : > { %v1604_v0 = vmax.f32 %v457_v37, 0.0 }
 0x17d   : > { %v459_v38 = vpop.f32.mrf.mxu0 }
 0x17e   : > { %v1610_v3 = vmax.f32 %v459_v38, 0.0  ;;  %v712_v11 = vmul.f32 %v1604_v0, %v1604_v0 }
 0x17f   : > { %v463_v39 = vpop.f32.mrf.mxu0 }
 0x180   : > { %v1600_v62 = vmax.f32 %v463_v39, 0.0  ;;  %v713_v15 = vmul.f32 %v1610_v3, %v1610_v3 }
 0x181   : > { %v465_v40 = vpop.f32.mrf.mxu0 }
 0x182   : > { %v1602_v63 = vmax.f32 %v465_v40, 0.0  ;;  %v714_v6 = vmul.f32 %v1600_v62, %v1600_v62 }
 0x183   : > { %v469_v41 = vpop.f32.mrf.mxu0 }
 0x184   : > { %v1606_v1 = vmax.f32 %v469_v41, 0.0  ;;  %v715_v8 = vmul.f32 %v1602_v63, %v1602_v63  ;;  %v776_v19 = vadd.f32 %v714_v6, %v712_v11 }
 0x185   : > { %v471_v42 = vpop.f32.mrf.mxu0 }
 0x186   : > { %v1612_v4 = vmax.f32 %v471_v42, 0.0  ;;  %v716_v12 = vmul.f32 %v1606_v1, %v1606_v1  ;;  %v813_v22 = vadd.f32 %v715_v8, %v713_v15 }
 0x187   : > { %v475_v43 = vpop.f32.mrf.mxu0 }
 0x188   : > { %v1618_v7 = vmax.f32 %v475_v43, 0.0  ;;  %v717_v16 = vmul.f32 %v1612_v4, %v1612_v4  ;;  %v777_v26 = vadd.f32 %v776_v19, %v716_v12 }
 0x189   : > { %v477_v44 = vpop.f32.mrf.mxu0 }
 0x18a   : > { %v1622_v9 = vmax.f32 %v477_v44, 0.0  ;;  %v718_v20 = vmul.f32 %v1618_v7, %v1618_v7  ;;  %v814_v30 = vadd.f32 %v813_v22, %v717_v16 }
 0x18b   : > { %v481_v45 = vpop.f32.mrf.mxu0 }
 0x18c   : > { %v1630_v13 = vmax.f32 %v481_v45, 0.0  ;;  %v719_v23 = vmul.f32 %v1622_v9, %v1622_v9  ;;  %v778_v34 = vadd.f32 %v777_v26, %v718_v20 }
 0x18d   : > { %v483_v46 = vpop.f32.mrf.mxu0 }
 0x18e   : > { %v1638_v17 = vmax.f32 %v483_v46, 0.0  ;;  %v720_v27 = vmul.f32 %v1630_v13, %v1630_v13  ;;  %v815_v37 = vadd.f32 %v814_v30, %v719_v23 }
 0x18f   : > { %v487_v47 = vpop.f32.mrf.mxu0 }
 0x190   : > { %v1644_v21 = vmax.f32 %v487_v47, 0.0  ;;  %v721_v31 = vmul.f32 %v1638_v17, %v1638_v17  ;;  %v779_v41 = vadd.f32 %v778_v34, %v720_v27 }
 0x191   : > { %v489_v48 = vpop.f32.mrf.mxu0 }
 0x192   : > { %v1648_v24 = vmax.f32 %v489_v48, 0.0  ;;  %v722_v35 = vmul.f32 %v1644_v21, %v1644_v21  ;;  %v816_v45 = vadd.f32 %v815_v37, %v721_v31 }
 0x193   : > { %v493_v49 = vpop.f32.mrf.mxu0 }
 0x194   : > { %v1654_v28 = vmax.f32 %v493_v49, 0.0  ;;  %v723_v38 = vmul.f32 %v1648_v24, %v1648_v24  ;;  %v780_v49 = vadd.f32 %v779_v41, %v722_v35 }
 0x195   : > { %v495_v50 = vpop.f32.mrf.mxu0 }
 0x196   : > { %v1658_v32 = vmax.f32 %v495_v50, 0.0  ;;  %v724_v42 = vmul.f32 %v1654_v28, %v1654_v28 }
 0x197   : > { %v499_v51 = vpop.f32.mrf.mxu0 }
 0x198   : > { %v1664_v36 = vmax.f32 %v499_v51, 0.0  ;;  %v725_v46 = vmul.f32 %v1658_v32, %v1658_v32  ;;  %v781_v11 = vadd.f32 %v780_v49, %v724_v42 }
 0x199   : > { %v501_v52 = vpop.f32.mrf.mxu0 }
 0x19a   : > { %v1668_v39 = vmax.f32 %v501_v52, 0.0  ;;  %v726_v50 = vmul.f32 %v1664_v36, %v1664_v36  ;;  %v817_v52 = vadd.f32 %v816_v45, %v723_v38 }
 0x19b   : > { %v505_v53 = vpop.f32.mrf.mxu0 }
 0x19c   : > { %v1674_v43 = vmax.f32 %v505_v53, 0.0  ;;  %v727_v53 = vmul.f32 %v1668_v39, %v1668_v39  ;;  %v818_v16 = vadd.f32 %v817_v52, %v725_v46 }
 0x19d   : > { %v507_v54 = vpop.f32.mrf.mxu0 }
 0x19e   : > { %v1678_v47 = vmax.f32 %v507_v54, 0.0  ;;  %v728_v54 = vmul.f32 %v1674_v43, %v1674_v43  ;;  %v819_v26 = vadd.f32 %v818_v16, %v727_v53 }
 0x19f   : > { %v511_v55 = vpop.f32.mrf.mxu0 }
 0x1a0   : > { %v1684_v51 = vmax.f32 %v511_v55, 0.0  ;;  %v729_v55 = vmul.f32 %v1678_v47, %v1678_v47 }
 0x1a1   : > { %v513_v56 = vpop.f32.mrf.mxu0 }
 0x1a2   : > { %v1688_v6 = vmax.f32 %v513_v56, 0.0  ;;  %v782_v56 = vadd.f32 %v781_v11, %v726_v50  ;;  %v730_v22 = vmul.f32 %v1684_v51, %v1684_v51  ;;  %v820_v37 = vadd.f32 %v819_v26, %v729_v55 }
 0x1a3   : > { %v1590_v57 = vpop.f32.mrf.mxu0 }
 0x1a4   : > { %v1695_v12 = vmax.f32 %v1590_v57, 0.0  ;;  %v731_v57 = vmul.f32 %v1688_v6, %v1688_v6 }
 0x1a5   : > { %v1592_v58 = vpop.f32.mrf.mxu0 }
 0x1a6   : > { %v1700_v19 = vmax.f32 %v1592_v58, 0.0  ;;  %v783_v58 = vadd.f32 %v782_v56, %v728_v54  ;;  %v732_v31 = vmul.f32 %v1695_v12, %v1695_v12  ;;  %v821_v46 = vadd.f32 %v820_v37, %v731_v57 }
 0x1a7   : > { %v1594_v59 = vpop.f32.mrf.mxu0 }
 0x1a8   : > { %2142 = vst [vmem:[#allocation11_spill] sm:$0xff] %v1700_v19  ;;  %v1707_v23 = vmax.f32 %v1594_v59, 0.0  ;;  %v733_v59 = vmul.f32 %v1700_v19, %v1700_v19 }
 0x1a9   : > { %v1596_v60 = vpop.f32.mrf.mxu0 }
 0x1aa   : > { %v1712_v27 = vmax.f32 %v1596_v60, 0.0  ;;  %v784_v60 = vadd.f32 %v783_v58, %v730_v22  ;;  %v734_v42 = vmul.f32 %v1707_v23, %v1707_v23  ;;  %v822_v54 = vadd.f32 %v821_v46, %v733_v59 }
 0x1ab   : > { %v1598_v61 = vpop.f32.mrf.mxu0 }
 0x1ac   : > { %2143 = vst [vmem:[#allocation12_spill] sm:$0xff] %v1712_v27  ;;  %v1719_v34 = vmax.f32 %v1598_v61, 0.0  ;;  %v735_v61 = vmul.f32 %v1712_v27, %v1712_v27  ;;  %v785_v52 = vadd.f32 %v784_v60, %v732_v31 }
 0x1ad   : > { %v1608_v2 = vpop.f32.mrf.mxu0 }
 0x1ae   : > { %v1724_v38 = vmax.f32 %v1608_v2, 0.0  ;;  %v736_v2 = vmul.f32 %v1719_v34, %v1719_v34  ;;  %v786_v56 = vadd.f32 %v785_v52, %v734_v42  ;;  %v823_v26 = vadd.f32 %v822_v54, %v735_v61 }
 0x1af   : > { %v1632_v14 = vpop.f32.mrf.mxu0 }
 0x1b0   : > { %2144 = vst [vmem:[#allocation13_spill] sm:$0xff] %v1724_v38  ;;  %v1729_v45 = vmax.f32 %v1632_v14, 0.0  ;;  %v737_v16 = vmul.f32 %v1724_v38, %v1724_v38  ;;  %v787_v31 = vadd.f32 %v786_v56, %v736_v2 }
 0x1b1   : > { %v537_v29 = vpop.f32.mrf.mxu0 }
 0x1b2   : > { %v1733_v49 = vmax.f32 %v537_v29, 0.0  ;;  %v738_v29 = vmul.f32 %v1729_v45, %v1729_v45  ;;  %v824_v59 = vadd.f32 %v823_v26, %v737_v16 }
 0x1b3   : > { %v541_v44 = vpop.f32.mrf.mxu0 }
 0x1b4   : > { %2145 = vst [vmem:[#allocation14_spill] sm:$0xff] %v1733_v49  ;;  %v1737_v53 = vmax.f32 %v541_v44, 0.0  ;;  %v739_v57 = vmul.f32 %v1733_v49, %v1733_v49  ;;  %v788_v46 = vadd.f32 %v787_v31, %v738_v29 }
 0x1b5   : > { %v543_v15 = vpop.f32.mrf.mxu0 }
 0x1b6   : > { %v1741_v14 = vmax.f32 %v543_v15, 0.0  ;;  %v740_v37 = vmul.f32 %v1737_v53, %v1737_v53  ;;  %v825_v2 = vadd.f32 %v824_v59, %v739_v57 }
 0x1b7   : > { %v547_v35 = vpop.f32.mrf.mxu0 }
 0x1b8   : > { %2146 = vst [vmem:[#allocation15_spill] sm:$0xff] %v1741_v14  ;;  %v1745_v22 = vmax.f32 %v547_v35, 0.0  ;;  %v741_v60 = vmul.f32 %v1741_v14, %v1741_v14  ;;  %v789_v16 = vadd.f32 %v788_v46, %v740_v37 }
 0x1b9   : > { %v549_v11 = vpop.f32.mrf.mxu0 }
 0x1ba   : > { %v1749_v44 = vmax.f32 %v549_v11, 0.0  ;;  %v742_v61 = vmul.f32 %v1745_v22, %v1745_v22  ;;  %v826_v29 = vadd.f32 %v825_v2, %v741_v60 }
 0x1bb   : > { %v1614_v5 = vpop.f32.mrf.mxu1 }
 0x1bc   : > { %2147 = vst [vmem:[#allocation16_spill] sm:$0xff] %v1749_v44  ;;  %v1754_v15 = vmax.f32 %v1614_v5, 0.0  ;;  %v743_v5 = vmul.f32 %v1749_v44, %v1749_v44  ;;  %v790_v31 = vadd.f32 %v789_v16, %v742_v61 }
 0x1bd   : > { %v1624_v10 = vpop.f32.mrf.mxu1 }
 0x1be   : > { %v1759_v35 = vmax.f32 %v1624_v10, 0.0  ;;  %v744_v10 = vmul.f32 %v1754_v15, %v1754_v15  ;;  %v827_v59 = vadd.f32 %v826_v29, %v743_v5 }
 0x1bf   : > { %v1640_v18 = vpop.f32.mrf.mxu1 }
 0x1c0   : > { %2148 = vst [vmem:[#allocation17_spill] sm:$0xff] %v1759_v35  ;;  %v1764_v52 = vmax.f32 %v1640_v18, 0.0  ;;  %v745_v18 = vmul.f32 %v1759_v35, %v1759_v35  ;;  %v791_v2 = vadd.f32 %v790_v31, %v744_v10 }
 0x1c1   : > { %v1650_v25 = vpop.f32.mrf.mxu1 }
 0x1c2   : > { %v1769_v11 = vmax.f32 %v1650_v25, 0.0  ;;  %v746_v25 = vmul.f32 %v1764_v52, %v1764_v52  ;;  %v828_v16 = vadd.f32 %v827_v59, %v745_v18 }
 0x1c3   : > { %v1660_v33 = vpop.f32.mrf.mxu1 }
 0x1c4   : > { %2149 = vst [vmem:[#allocation18_spill] sm:$0xff] %v1769_v11  ;;  %v1774_v56 = vmax.f32 %v1660_v33, 0.0  ;;  %v747_v33 = vmul.f32 %v1769_v11, %v1769_v11  ;;  %v792_v11 = vadd.f32 %v791_v2, %v746_v25 }
 0x1c5   : > { %v1670_v40 = vpop.f32.mrf.mxu1 }
 0x1c6   : > { %v1779_v26 = vmax.f32 %v1670_v40, 0.0  ;;  %v748_v40 = vmul.f32 %v1774_v56, %v1774_v56  ;;  %v829_v10 = vadd.f32 %v828_v16, %v747_v33 }
 0x1c7   : > { %v1680_v48 = vpop.f32.mrf.mxu1 }
 0x1c8   : > { %2150 = vst [vmem:[#allocation19_spill] sm:$0xff] %v1779_v26  ;;  %v1784_v37 = vmax.f32 %v1680_v48, 0.0  ;;  %v749_v48 = vmul.f32 %v1779_v26, %v1779_v26  ;;  %v793_v59 = vadd.f32 %v792_v11, %v748_v40 }
 0x1c9   : > { %v1690_v8 = vpop.f32.mrf.mxu1 }
 0x1ca   : > { %v1789_v60 = vmax.f32 %v1690_v8, 0.0  ;;  %v750_v8 = vmul.f32 %v1784_v37, %v1784_v37  ;;  %v830_v44 = vadd.f32 %v829_v10, %v749_v48 }
 0x1cb   : > { %v1702_v20 = vpop.f32.mrf.mxu1 }
 0x1cc   : > { %2151 = vst [vmem:[#allocation20_spill] sm:$0xff] %v1789_v60  ;;  %v1794_v61 = vmax.f32 %v1702_v20, 0.0  ;;  %v751_v31 = vmul.f32 %v1789_v60, %v1789_v60  ;;  %v794_v33 = vadd.f32 %v793_v59, %v750_v8 }
 0x1cd   : > { %v1714_v30 = vpop.f32.mrf.mxu1 }
 0x1ce   : > { %v1799_v5 = vmax.f32 %v1714_v30, 0.0  ;;  %v752_v26 = vmul.f32 %v1794_v61, %v1794_v61  ;;  %v831_v60 = vadd.f32 %v830_v44, %v751_v31 }
 0x1cf   : > { %v583_v41 = vpop.f32.mrf.mxu1 }
 0x1d0   : > { %2152 = vst [vmem:[#allocation21_spill] sm:$0xff] %v1799_v5  ;;  %v1803_v35 = vmax.f32 %v583_v41, 0.0  ;;  %v753_v25 = vmul.f32 %v1799_v5, %v1799_v5  ;;  %v795_v48 = vadd.f32 %v794_v33, %v752_v26 }
 0x1d1   : > { %v585_v50 = vpop.f32.mrf.mxu1 }
 0x1d2   : > { %v1807_v20 = vmax.f32 %v585_v50, 0.0  ;;  %v754_v16 = vmul.f32 %v1803_v35, %v1803_v35  ;;  %v832_v5 = vadd.f32 %v831_v60, %v753_v25 }
 0x1d3   : > { %v589_v55 = vpop.f32.mrf.mxu1 }
 0x1d4   : > { %2153 = vst [vmem:[#allocation22_spill] sm:$0xff] %v1807_v20  ;;  %v1811_v30 = vmax.f32 %v589_v55, 0.0  ;;  %v755_v11 = vmul.f32 %v1807_v20, %v1807_v20  ;;  %v796_v44 = vadd.f32 %v795_v48, %v754_v16 }
 0x1d5   : > { %v591_v58 = vpop.f32.mrf.mxu1 }
 0x1d6   : > { %v1815_v2 = vmax.f32 %v591_v58, 0.0  ;;  %v756_v10 = vmul.f32 %v1811_v30, %v1811_v30  ;;  %v833_v20 = vadd.f32 %v832_v5, %v755_v11 }
 0x1d7   : > { %v595_v42 = vpop.f32.mrf.mxu1 }
 0x1d8   : > { %2154 = vst [vmem:[#allocation23_spill] sm:$0xff] %v1815_v2  ;;  %v1819_v50 = vmax.f32 %v595_v42, 0.0  ;;  %v757_v8 = vmul.f32 %v1815_v2, %v1815_v2  ;;  %v797_v60 = vadd.f32 %v796_v44, %v756_v10 }
 0x1d9   : > { %v597_v54 = vpop.f32.mrf.mxu1 }
 0x1da   : > { %v1823_v40 = vmax.f32 %v597_v54, 0.0  ;;  %v758_v31 = vmul.f32 %v1819_v50, %v1819_v50  ;;  %v834_v2 = vadd.f32 %v833_v20, %v757_v8 }
 0x1db   : > { %v601_v57 = vpop.f32.mrf.mxu1 }
 0x1dc   : > { %2155 = vst [vmem:[#allocation24_spill] sm:$0xff] %v1823_v40  ;;  %v1827_v58 = vmax.f32 %v601_v57, 0.0  ;;  %v759_v26 = vmul.f32 %v1823_v40, %v1823_v40  ;;  %v798_v5 = vadd.f32 %v797_v60, %v758_v31 }
 0x1dd   : > { %v603_v46 = vpop.f32.mrf.mxu1 }
 0x1de   : > { %v1831_v59 = vmax.f32 %v603_v46, 0.0  ;;  %v760_v25 = vmul.f32 %v1827_v58, %v1827_v58  ;;  %v835_v40 = vadd.f32 %v834_v2, %v759_v26 }
 0x1df   : > { %v607_v29 = vpop.f32.mrf.mxu1 }
 0x1e0   : > { %2156 = vst [vmem:[#allocation25_spill] sm:$0xff] %v1831_v59  ;;  %v1835_v54 = vmax.f32 %v607_v29, 0.0  ;;  %v761_v16 = vmul.f32 %v1831_v59, %v1831_v59  ;;  %v799_v20 = vadd.f32 %v798_v5, %v760_v25 }
 0x1e1   : > { %v609_v18 = vpop.f32.mrf.mxu1 }
 0x1e2   : > { %v1839_v33 = vmax.f32 %v609_v18, 0.0  ;;  %v762_v11 = vmul.f32 %v1835_v54, %v1835_v54  ;;  %v836_v59 = vadd.f32 %v835_v40, %v761_v16 }
 0x1e3   : > { %v613_v41 = vpop.f32.mrf.mxu1 }
 0x1e4   : > { %2157 = vst [vmem:[#allocation26_spill] sm:$0xff] %v1839_v33  ;;  %v1843_v46 = vmax.f32 %v613_v41, 0.0  ;;  %v763_v10 = vmul.f32 %v1839_v33, %v1839_v33 }
 0x1e5   : > { %v615_v55 = vpop.f32.mrf.mxu1 }
 0x1e6   : > { %v1847_v48 = vmax.f32 %v615_v55, 0.0  ;;  %v764_v8 = vmul.f32 %v1843_v46, %v1843_v46  ;;  %v837_v33 = vadd.f32 %v836_v59, %v763_v10 }
 0x1e7   : > { %v619_v42 = vpop.f32.mrf.mxu1 }
 0x1e8   : > { %2158 = vst [vmem:[#allocation27_spill] sm:$0xff] %v1847_v48  ;;  %v1851_v18 = vmax.f32 %v619_v42, 0.0  ;;  %v765_v31 = vmul.f32 %v1847_v48, %v1847_v48  ;;  %v800_v42 = vadd.f32 %v799_v20, %v762_v11 }
 0x1e9   : > { %v621_v57 = vpop.f32.mrf.mxu1 }
 0x1ea   : > { %v1855_v44 = vmax.f32 %v621_v57, 0.0  ;;  %v766_v2 = vmul.f32 %v1851_v18, %v1851_v18  ;;  %v838_v48 = vadd.f32 %v837_v33, %v765_v31 }
 0x1eb   : > { %v625_v29 = vpop.f32.mrf.mxu1 }
 0x1ec   : > { %2159 = vst [vmem:[#allocation28_spill] sm:$0xff] %v1855_v44  ;;  %v1859_v55 = vmax.f32 %v625_v29, 0.0  ;;  %v767_v25 = vmul.f32 %v1855_v44, %v1855_v44  ;;  %v801_v29 = vadd.f32 %v800_v42, %v764_v8 }
 0x1ed   : > { %v627_v41 = vpop.f32.mrf.mxu1 }
 0x1ee   : > { %v1865_v26 = vmax.f32 %v627_v41, 0.0  ;;  %v768_v40 = vmul.f32 %v1859_v55, %v1859_v55  ;;  %v802_v20 = vadd.f32 %v801_v29, %v766_v2  ;;  %v839_v10 = vadd.f32 %v838_v48, %v767_v25 }
 0x1ef   : > { %v631_v60 = vpop.f32.mrf.mxu1 }
 0x1f0   : > { %2160 = vst [vmem:[#allocation29_spill] sm:$0xff] %v1865_v26  ;;  %v1867_v57 = vmax.f32 %v631_v60, 0.0  ;;  %v769_v41 = vmul.f32 %v1865_v26, %v1865_v26  ;;  %v803_v14 = vadd.f32 %v802_v20, %v768_v40 }
 0x1f1   : > { %v633_v5 = vpop.f32.mrf.mxu1 }
 0x1f2   : > { %v1873_v16 = vmax.f32 %v633_v5, 0.0  ;;  %v770_v60 = vmul.f32 %v1867_v57, %v1867_v57  ;;  %v840_v2 = vadd.f32 %v839_v10, %v769_v41 }
 0x1f3   : > { %v637_v11 = vpop.f32.mrf.mxu1 }
 0x1f4   : > { %2161 = vst [vmem:[#allocation30_spill] sm:$0xff] %v1873_v16  ;;  %v1879_v59 = vmax.f32 %v637_v11, 0.0  ;;  %v771_v8 = vmul.f32 %v1873_v16, %v1873_v16  ;;  %v804_v5 = vadd.f32 %v803_v14, %v770_v60 }
 0x1f5   : > { %v639_v44 = vpop.f32.mrf.mxu1 }
 0x1f6   : > { %v772_v42 = vmul.f32 %v1879_v59, %v1879_v59  ;;  %v1885_v33 = vmax.f32 %v639_v44, 0.0  ;;  %v841_v49 = vadd.f32 %v840_v2, %v771_v8 }
 0x1f7   : > { %v643_v31 = vpop.f32.mrf.mxu1 }
 0x1f8   : > { %2162 = vst [vmem:[#allocation31_spill] sm:$0xff] %v1885_v33  ;;  %v773_v29 = vmul.f32 %v1885_v33, %v1885_v33  ;;  %v710_v26 = vmax.f32 %v643_v31, 0.0  ;;  %v805_v48 = vadd.f32 %v804_v5, %v772_v42 }
 0x1f9   : > { %v645_v11 = vpop.f32.mrf.mxu1 }
 0x1fa   : > { %v774_v25 = vmul.f32 %v710_v26, %v710_v26  ;;  %v1889_v40 = vmax.f32 %v645_v11, 0.0  ;;  %v842_v20 = vadd.f32 %v841_v49, %v773_v29 }
 0x1fc   : > { %v806_v16 = vadd.f32 %v805_v48, %v774_v25  ;;  %v775_v38 = vmul.f32 %v1889_v40, %v1889_v40 }
 0x1fe   : > { %v807_v44 = vrot.slane %v806_v16, 4  ;;  %v843_v27 = vadd.f32 %v842_v20, %v775_v38 }
 0x200   : > { %v808_v41 = vadd.f32 %v807_v44, %v806_v16  ;;  %v844_v14 = vrot.slane %v843_v27, 4  ;;  %v2165_v44 = vld [vmem:[#allocation13_spill] sm:$0xff] }
 0x202   : > { %v809_v60 = vrot.slane %v808_v41, 2  ;;  %v845_v10 = vadd.f32 %v844_v14, %v843_v27 }
 0x204   : > { %v810_v33 = vadd.f32 %v809_v60, %v808_v41  ;;  %v846_v31 = vrot.slane %v845_v10, 2  ;;  %v2166_v41 = vld [vmem:[#allocation14_spill] sm:$0xff]  ;;  %v2168_v60 = vld [vmem:[#allocation16_spill] sm:$0xff] }
 0x206   : > { %v811_v19 = vrot.slane %v810_v33, 1  ;;  %v847_v8 = vadd.f32 %v846_v31, %v845_v10  ;;  %v2169_v31 = vld [vmem:[#allocation17_spill] sm:$0xff] }
 0x208   : > { %v812_v42 = vadd.f32 %v811_v19, %v810_v33  ;;  %v848_v2 = vrot.slane %v847_v8, 1 }
 0x20a   : > { %v850_v5 = vadd.f32 1e-06, %v812_v42  ;;  %v849_v11 = vadd.f32 %v848_v2, %v847_v8  ;;  %v2170_v42 = vld [vmem:[#allocation18_spill] sm:$0xff] }
 0x20c   : > { %1238 = vrsqrt.f32 %v850_v5  ;;  %v851_v49 = vadd.f32 1e-06, %v849_v11  ;;  %v2171_v5 = vld [vmem:[#allocation19_spill] sm:$0xff] }
 0x20e   : > { %1240 = vrsqrt.f32 %v851_v49  ;;  %v2172_v49 = vld [vmem:[#allocation20_spill] sm:$0xff] }
 0x219   : > { %v1239_v29 = vpop.eup %1238 }
 0x21a   : > { %v916_v48 = vmul.f32 %v1239_v29, %v710_v26  ;;  %v854_v38 = vmul.f32 %v1239_v29, %v1604_v0  ;;  %v856_v16 = vmul.f32 %v1239_v29, %v1600_v62  ;;  %v858_v27 = vmul.f32 %v1239_v29, %v1606_v1 }
 0x21b   : > { %v860_v25 = vmul.f32 %v1239_v29, %v1618_v7  ;;  %v862_v20 = vmul.f32 %v1239_v29, %v1630_v13  ;;  %v864_v19 = vmul.f32 %v1239_v29, %v1644_v21  ;;  %v866_v33 = vmul.f32 %v1239_v29, %v1654_v28 }
 0x21c   : > { %980 = vst [vmem:[%s1901_s18 + $0x1f0] sm:$0xff] %v916_v48  ;;  %v868_v62 = vmul.f32 %v1239_v29, %v1664_v36  ;;  %v870_v0 = vmul.f32 %v1239_v29, %v1674_v43  ;;  %v872_v1 = vmul.f32 %v1239_v29, %v1684_v51  ;;  %v874_v7 = vmul.f32 %v1239_v29, %v1695_v12  ;;  %v2173_v48 = vld [vmem:[#allocation21_spill] sm:$0xff] }
 0x21d   : > { %918 = vst [vmem:[%s1901_s18] sm:$0xff] %v854_v38  ;;  %920 = vst [vmem:[%s1901_s18 + $0x10] sm:$0xff] %v856_v16  ;;  %v876_v13 = vmul.f32 %v1239_v29, %v1707_v23  ;;  %v878_v21 = vmul.f32 %v1239_v29, %v1719_v34  ;;  %v880_v28 = vmul.f32 %v1239_v29, %v1729_v45  ;;  %v1927_v34 = vpop.eup %1240  ;;  %v2174_v16 = vld [vmem:[#allocation22_spill] sm:$0xff] }
 0x21e   : > { %922 = vst [vmem:[%s1901_s18 + $0x20] sm:$0xff] %v858_v27  ;;  %v882_v36 = vmul.f32 %v1239_v29, %v1737_v53  ;;  %924 = vst [vmem:[%s1901_s18 + $0x30] sm:$0xff] %v860_v25  ;;  %v884_v43 = vmul.f32 %v1239_v29, %v1745_v22  ;;  %v886_v51 = vmul.f32 %v1239_v29, %v1754_v15  ;;  %v2175_v25 = vld [vmem:[#allocation23_spill] sm:$0xff] }
 0x21f   : > { %926 = vst [vmem:[%s1901_s18 + $0x40] sm:$0xff] %v862_v20  ;;  %928 = vst [vmem:[%s1901_s18 + $0x50] sm:$0xff] %v864_v19  ;;  %v888_v12 = vmul.f32 %v1239_v29, %v1764_v52  ;;  %v890_v23 = vmul.f32 %v1239_v29, %v1774_v56  ;;  %v892_v45 = vmul.f32 %v1239_v29, %v1784_v37  ;;  %v2176_v19 = vld [vmem:[#allocation24_spill] sm:$0xff] }
 0x220   : > { %930 = vst [vmem:[%s1901_s18 + $0x60] sm:$0xff] %v866_v33  ;;  %932 = vst [vmem:[%s1901_s18 + $0x70] sm:$0xff] %v868_v62  ;;  %v894_v53 = vmul.f32 %v1239_v29, %v1794_v61  ;;  %v896_v22 = vmul.f32 %v1239_v29, %v1803_v35  ;;  %v898_v15 = vmul.f32 %v1239_v29, %v1811_v30  ;;  %v2177_v62 = vld [vmem:[#allocation25_spill] sm:$0xff] }
 0x221   : > { %934 = vst [vmem:[%s1901_s18 + $0x80] sm:$0xff] %v870_v0  ;;  %936 = vst [vmem:[%s1901_s18 + $0x90] sm:$0xff] %v872_v1  ;;  %v900_v52 = vmul.f32 %v1239_v29, %v1819_v50  ;;  %v902_v56 = vmul.f32 %v1239_v29, %v1827_v58  ;;  %v904_v37 = vmul.f32 %v1239_v29, %v1835_v54  ;;  %v2178_v1 = vld [vmem:[#allocation26_spill] sm:$0xff] }
 0x222   : > { %938 = vst [vmem:[%s1901_s18 + $0xa0] sm:$0xff] %v874_v7  ;;  %940 = vst [vmem:[%s1901_s18 + $0xb0] sm:$0xff] %v876_v13  ;;  %v906_v61 = vmul.f32 %v1239_v29, %v1843_v46  ;;  %v908_v35 = vmul.f32 %v1239_v29, %v1851_v18  ;;  %v910_v30 = vmul.f32 %v1239_v29, %v1859_v55  ;;  %v2179_v13 = vld [vmem:[#allocation27_spill] sm:$0xff] }
 0x223   : > { %942 = vst [vmem:[%s1901_s18 + $0xc0] sm:$0xff] %v878_v21  ;;  %944 = vst [vmem:[%s1901_s18 + $0xd0] sm:$0xff] %v880_v28  ;;  %v912_v50 = vmul.f32 %v1239_v29, %v1867_v57  ;;  %v914_v58 = vmul.f32 %v1239_v29, %v1879_v59  ;;  %v917_v54 = vmul.f32 %v1927_v34, %v1889_v40  ;;  %v2164_v59 = vld [vmem:[#allocation12_spill] sm:$0xff] }
 0x224   : > { %946 = vst [vmem:[%s1901_s18 + $0xe0] sm:$0xff] %v882_v36  ;;  %948 = vst [vmem:[%s1901_s18 + $0xf0] sm:$0xff] %v884_v43  ;;  %v855_v46 = vmul.f32 %v1927_v34, %v1610_v3  ;;  %v857_v18 = vmul.f32 %v1927_v34, %v1602_v63  ;;  %v859_v55 = vmul.f32 %v1927_v34, %v1612_v4  ;;  %v2180_v28 = vld [vmem:[#allocation28_spill] sm:$0xff]  ;;  %v2181_v43 = vld [vmem:[#allocation29_spill] sm:$0xff] }
 0x225   : > { %950 = vst [vmem:[%s1901_s18 + $0x100] sm:$0xff] %v886_v51  ;;  %952 = vst [vmem:[%s1901_s18 + $0x110] sm:$0xff] %v888_v12  ;;  %v861_v26 = vmul.f32 %v1927_v34, %v1622_v9  ;;  %v863_v57 = vmul.f32 %v1927_v34, %v1638_v17  ;;  %v865_v3 = vmul.f32 %v1927_v34, %v1648_v24  ;;  %v2163_v24 = vld [vmem:[#allocation11_spill] sm:$0xff]  ;;  %v2182_v12 = vld [vmem:[#allocation30_spill] sm:$0xff] }
 0x226   : > { %954 = vst [vmem:[%s1901_s18 + $0x120] sm:$0xff] %v890_v23  ;;  %956 = vst [vmem:[%s1901_s18 + $0x130] sm:$0xff] %v892_v45  ;;  %v867_v63 = vmul.f32 %v1927_v34, %v1658_v32  ;;  %v869_v4 = vmul.f32 %v1927_v34, %v1668_v39  ;;  %v871_v9 = vmul.f32 %v1927_v34, %v1678_v47  ;;  %v2183_v45 = vld [vmem:[#allocation31_spill] sm:$0xff] }
 0x227   : > { %958 = vst [vmem:[%s1901_s18 + $0x140] sm:$0xff] %v894_v53  ;;  %960 = vst [vmem:[%s1901_s18 + $0x150] sm:$0xff] %v896_v22  ;;  %v873_v17 = vmul.f32 %v1927_v34, %v1688_v6  ;;  %v875_v32 = vmul.f32 %v1927_v34, %v2163_v24  ;;  %v877_v40 = vmul.f32 %v1927_v34, %v2164_v59  ;;  %v2167_v6 = vld [vmem:[#allocation15_spill] sm:$0xff] }
 0x228   : > { %962 = vst [vmem:[%s1901_s18 + $0x160] sm:$0xff] %v898_v15  ;;  %964 = vst [vmem:[%s1901_s18 + $0x170] sm:$0xff] %v900_v52  ;;  %v879_v39 = vmul.f32 %v1927_v34, %v2165_v44  ;;  %v881_v47 = vmul.f32 %v1927_v34, %v2166_v41  ;;  %v883_v14 = vmul.f32 %v1927_v34, %v2167_v6 }
 0x229   : > { %966 = vst [vmem:[%s1901_s18 + $0x180] sm:$0xff] %v902_v56  ;;  %968 = vst [vmem:[%s1901_s18 + $0x190] sm:$0xff] %v904_v37  ;;  %v885_v10 = vmul.f32 %v1927_v34, %v2168_v60  ;;  %v887_v8 = vmul.f32 %v1927_v34, %v2169_v31  ;;  %v889_v2 = vmul.f32 %v1927_v34, %v2170_v42 }
 0x22a   : > { %970 = vst [vmem:[%s1901_s18 + $0x1a0] sm:$0xff] %v906_v61  ;;  %972 = vst [vmem:[%s1901_s18 + $0x1b0] sm:$0xff] %v908_v35  ;;  %v891_v11 = vmul.f32 %v1927_v34, %v2171_v5  ;;  %v893_v29 = vmul.f32 %v1927_v34, %v2172_v49  ;;  %v895_v38 = vmul.f32 %v1927_v34, %v2173_v48 }
 0x22b   : > { %974 = vst [vmem:[%s1901_s18 + $0x1c0] sm:$0xff] %v910_v30  ;;  %976 = vst [vmem:[%s1901_s18 + $0x1d0] sm:$0xff] %v912_v50  ;;  %v897_v27 = vmul.f32 %v1927_v34, %v2174_v16  ;;  %v899_v20 = vmul.f32 %v1927_v34, %v2175_v25  ;;  %v901_v33 = vmul.f32 %v1927_v34, %v2176_v19 }
 0x22c   : > { %978 = vst [vmem:[%s1901_s18 + $0x1e0] sm:$0xff] %v914_v58  ;;  %981 = vst [vmem:[%s1901_s18 + $0x1f8] sm:$0xff] %v917_v54  ;;  %v903_v0 = vmul.f32 %v1927_v34, %v2177_v62  ;;  %v905_v7 = vmul.f32 %v1927_v34, %v2178_v1  ;;  %v907_v21 = vmul.f32 %v1927_v34, %v2179_v13 }
 0x22d   : > { %919 = vst [vmem:[%s1901_s18 + $0x8] sm:$0xff] %v855_v46  ;;  %921 = vst [vmem:[%s1901_s18 + $0x18] sm:$0xff] %v857_v18  ;;  %v909_v36 = vmul.f32 %v1927_v34, %v2180_v28  ;;  %v911_v51 = vmul.f32 %v1927_v34, %v2181_v43  ;;  %v913_v23 = vmul.f32 %v1927_v34, %v2182_v12 }
 0x22e   : > { %923 = vst [vmem:[%s1901_s18 + $0x28] sm:$0xff] %v859_v55  ;;  %925 = vst [vmem:[%s1901_s18 + $0x38] sm:$0xff] %v861_v26  ;;  %v915_v53 = vmul.f32 %v1927_v34, %v2183_v45 }
 0x22f   : > { %927 = vst [vmem:[%s1901_s18 + $0x48] sm:$0xff] %v863_v57  ;;  %929 = vst [vmem:[%s1901_s18 + $0x58] sm:$0xff] %v865_v3 }
 0x230   : > { %931 = vst [vmem:[%s1901_s18 + $0x68] sm:$0xff] %v867_v63  ;;  %933 = vst [vmem:[%s1901_s18 + $0x78] sm:$0xff] %v869_v4 }
 0x231   : > { %935 = vst [vmem:[%s1901_s18 + $0x88] sm:$0xff] %v871_v9  ;;  %937 = vst [vmem:[%s1901_s18 + $0x98] sm:$0xff] %v873_v17 }
 0x232   : > { %939 = vst [vmem:[%s1901_s18 + $0xa8] sm:$0xff] %v875_v32  ;;  %941 = vst [vmem:[%s1901_s18 + $0xb8] sm:$0xff] %v877_v40 }
 0x233   : > { %943 = vst [vmem:[%s1901_s18 + $0xc8] sm:$0xff] %v879_v39  ;;  %945 = vst [vmem:[%s1901_s18 + $0xd8] sm:$0xff] %v881_v47 }
 0x234   : > { %947 = vst [vmem:[%s1901_s18 + $0xe8] sm:$0xff] %v883_v14  ;;  %949 = vst [vmem:[%s1901_s18 + $0xf8] sm:$0xff] %v885_v10 }
 0x235   : > { %951 = vst [vmem:[%s1901_s18 + $0x108] sm:$0xff] %v887_v8  ;;  %953 = vst [vmem:[%s1901_s18 + $0x118] sm:$0xff] %v889_v2 }
 0x236   : > { %955 = vst [vmem:[%s1901_s18 + $0x128] sm:$0xff] %v891_v11  ;;  %957 = vst [vmem:[%s1901_s18 + $0x138] sm:$0xff] %v893_v29 }
 0x237   : > { %959 = vst [vmem:[%s1901_s18 + $0x148] sm:$0xff] %v895_v38  ;;  %961 = vst [vmem:[%s1901_s18 + $0x158] sm:$0xff] %v897_v27 }
 0x238   : > { %963 = vst [vmem:[%s1901_s18 + $0x168] sm:$0xff] %v899_v20  ;;  %965 = vst [vmem:[%s1901_s18 + $0x178] sm:$0xff] %v901_v33 }
 0x239   : > { %967 = vst [vmem:[%s1901_s18 + $0x188] sm:$0xff] %v903_v0  ;;  %969 = vst [vmem:[%s1901_s18 + $0x198] sm:$0xff] %v905_v7 }
 0x23a   : > { %971 = vst [vmem:[%s1901_s18 + $0x1a8] sm:$0xff] %v907_v21  ;;  %973 = vst [vmem:[%s1901_s18 + $0x1b8] sm:$0xff] %v909_v36 }
 0x23b   : > { %975 = vst [vmem:[%s1901_s18 + $0x1c8] sm:$0xff] %v911_v51  ;;  %977 = vst [vmem:[%s1901_s18 + $0x1d8] sm:$0xff] %v913_v23 }
 0x23c   : > { %979 = vst [vmem:[%s1901_s18 + $0x1e8] sm:$0xff] %v915_v53 }
 0x23d   : > { %1311 = shalt.err (!%p1308_p6)
}
 0x23e   : > { %s1312_s6 = scalar_lea.hbm %s2042_s29, 8192  ;;  %s1316_s15 = scalar_lea.hbm %s2114_s2, 16384 }
 0x23f   : > { %p1313_p7 = scmp.ne.s32.totalorder %s2042_s29, %s1312_s6  ;;  %p1317_p4 = scmp.lt.s32.totalorder %s2042_s29, %s2114_s2 }
 0x240   : > { %p1318_p10 = scmp.lt.s32.totalorder %s1316_s15, %s1312_s6 }
 0x241   : > { %p1314_p1 = pnand %p1313_p7, %p1456_p9 }
 0x242   : > { %p1319_p8 = por %p1318_p10, %p1317_p4 }
 0x243   : > { %p1315_p2 = pneg %p1314_p1 }
 0x245   : > { %p1320_p0 = pnand %p1319_p8, %p1315_p2 }
 0x247   : > { %1323 = shalt.err (!%p1320_p0)
}
 0x248   : > { %s1388_s21 = smov 256   ;;  %s1389_s18 = smov 16  }
 0x249   : > { %1170 = dma.vmem_to_hbm [thread:$0]  (%p1456_p9), %s2044_s20, 8192, %s2042_s29, %s983_s3, %s1388_s21, %s1388_s21, %s1389_s18  }
 0x24a PF: > { %s1013_s19 = sand.u32 1, %s1362_s9   ;;  %p2184_p3 = scmp.ge.s32.totalorder %s1382_s14, 2 }
 0x24b   : > { %s1014_s12 = scalar_lea.sflag [#allocation4], %s1013_s19 }
 0x24c   : > { %p1180_p13 = pnand %p2184_p3, %p1463_p11 }
 0x24e   : > { %p1181_p5 = pneg %p1180_p13 }
 0x250   : > { %1357 = dma.done.wait (%p1181_p5), %s1014_s12, 8192  }
 0x251   : > { %1359 = vsyncadd (%p1181_p5), %s1014_s12, 4294959104  ;;  %s21_s14 = sadd.s32 1, %s1382_s14   ;;  %s2185_s9 = smov %s1366_s10 }
 0x252   : > { %p18_p12 = scmp.ge.s32.totalorder %s21_s14, 4   ;;  %s2186_s10 = smov %s1370_s11 }
 0x253   : > { %s2187_s11 = smov %s1461_s23  ;;  %s2188_s12 = smov %s1378_s13 }
 0x254   : > { %s2189_s13 = smov %s2191_s17  ;;  %20 = sbr.rel (!%p18_p12) target bundleno = 8 (0x8), region = 86 }
 0x259   :  { %1019 = vsyncpa [#allocation3], 1 }
 0x25a   :  { %1021 = vsyncpa [#allocation3 + $0x1], 1 }
 0x25b   :  { %1022 = vsyncpa [#allocation6], 1 }
 0x25c   :  { %1024 = vsyncpa [#allocation6 + $0x1], 1 }
 0x25d   :  { %1025 = vsyncpa [#allocation4], 1 }
 0x25e   :  { %1027 = vsyncpa [#allocation4 + $0x1], 1 }

</bundles_post_ra>
